<compile_context>
chip_gen: v6e
topology: v6e:2x2x1
jax: 0.10.0
libtpu: 0.0.40
codegen_flags: <defaults>
</compile_context>

<pallas_src>
import jax
import jax.numpy as jnp
from jax.experimental import pallas as pl
from jax.experimental.pallas import tpu as pltpu

_OUT_LANES = 8  # column 0 = character sigmoid, column 1 = quality sigmoid


def _round_up(n, m):
    return ((n + m - 1) // m) * m


def _cdiv(a, b):
    return -(-a // b)


def _fused_two_head_kernel(x_ref, w1_ref, b1_ref, w2_ref, b2_ref,
                           w3_ref, b3_ref, out_ref):
    # Layer 1: (TB, K_pad) @ (K_pad, 2H).  Character head in hidden lanes
    # [0:H), quality head in [H:2H).  Accumulate in f32 regardless of the
    # streaming dtype of x / w1.
    h = jnp.dot(x_ref[...], w1_ref[...], preferred_element_type=jnp.float32)
    h = jnp.maximum(h + b1_ref[...], 0.0)
    # Layer 2: block-diagonal (2H, 2H) keeps the two heads independent.
    h = jnp.dot(h, w2_ref[...], preferred_element_type=jnp.float32)
    h = jnp.maximum(h + b2_ref[...], 0.0)
    # Layer 3: (2H, 8) narrow output; cols 0/1 hold the two logits.  Sigmoid
    # only touches these 8 lanes.  Exact reciprocal (EUP has ample slack here)
    # keeps parity with the PyTorch sigmoid.
    z = jnp.dot(h, w3_ref[...], preferred_element_type=jnp.float32) + b3_ref[...]
    out_ref[...] = pl.reciprocal(1.0 + jnp.exp(-z), approx=False)


def pack_params(params, input_size=18):
    """One-time host-side fusion of the two heads into a single weight stack.

    Call once per parameter set (NOT per forward call).
    """
    f32 = jnp.float32
    cw1, qw1 = params["cw1"].astype(f32), params["qw1"].astype(f32)
    cw2, qw2 = params["cw2"].astype(f32), params["qw2"].astype(f32)
    cw3, qw3 = params["cw3"].astype(f32), params["qw3"].astype(f32)
    h = cw1.shape[1]
    k_pad = max(8, _round_up(input_size, 8))

    # Layer 1: heads side-by-side, contraction dim zero-padded to k_pad.
    w1 = jnp.concatenate([cw1, qw1], axis=1)                      # (in, 2H)
    w1 = jnp.pad(w1, ((0, k_pad - input_size), (0, 0)))           # (k_pad, 2H)
    b1 = jnp.concatenate([params["cb1"], params["qb1"]], axis=1).astype(f32)

    # Layer 2: block diagonal keeps the heads independent.
    zero = jnp.zeros((h, h), f32)
    w2 = jnp.block([[cw2, zero], [zero, qw2]])                    # (2H, 2H)
    b2 = jnp.concatenate([params["cb2"], params["qb2"]], axis=1).astype(f32)

    # Layer 3: block diagonal (2H, 2), zero-padded only to a narrow 8-lane
    # output (NOT 128) so the kernel's HBM writeback stays small.
    w3 = jnp.zeros((2 * h, _OUT_LANES), f32)
    w3 = w3.at[:h, 0].set(cw3[:, 0]).at[h:, 1].set(qw3[:, 0])
    b3 = jnp.zeros((1, _OUT_LANES), f32)
    b3 = b3.at[0, 0].set(params["cb3"][0, 0]).at[0, 1].set(params["qb3"][0, 0])

    return dict(w1=w1, b1=b1, w2=w2, b2=b2, w3=w3, b3=b3)


def _choose_batch_tile(B, max_tile_rows, sublane):
    """Adaptive batch tiling: large tiles, bounded padding waste, >=2 grid
    steps for mid/large batches (v7x megacore)."""
    max_tile = max(_round_up(max_tile_rows, sublane), sublane)
    n_tiles = _cdiv(B, max_tile)
    # For batches in the few-thousand range a single tile would run on one
    # TensorCore only; split so the "parallel" grid axis shards on v7x.  For
    # tiny batches fixed overhead dominates and one step is best.
    if n_tiles == 1 and B >= 1024:
        n_tiles = 2
    tb = _round_up(_cdiv(B, n_tiles), sublane)
    return tb, tb * n_tiles


def response_quality_forward(x, packed, *, tile_rows=8192, input_dtype=None):
    """Fused two-head MLP forward as a single Pallas kernel.

    Args:
        x: (B, input_size) float32 features.
        packed: dict produced by `pack_params`.
        tile_rows: max batch tile for the pipelined grid.
        input_dtype: optionally stream x (and layer-1 weights) in a narrower
            dtype, e.g. jnp.bfloat16 on HBM-bandwidth-poor v5e.  Accumulation
            stays float32; results drift slightly from the f32 reference.

    Returns:
        (character_score, quality_score), each float32 of shape (B,).
        NOTE: torch's `.squeeze()` returns a 0-d scalar for B == 1; this
        implementation always returns shape (B,).
    """
    B, feat = x.shape
    w1, b1 = packed["w1"], packed["b1"]
    w2, b2 = packed["w2"], packed["b2"]
    w3, b3 = packed["w3"], packed["b3"]
    k_pad, h2 = w1.shape

    if input_dtype is not None:
        x = x.astype(input_dtype)
        w1 = w1.astype(input_dtype)

    # Sublane multiple for the streamed dtype: 8 for f32, 16 for bf16.
    sublane = 16 if x.dtype == jnp.bfloat16 else 8
    tb, b_pad = _choose_batch_tile(max(B, 1), tile_rows, sublane)

    # Zero-pad rows to the tile boundary and features to the aligned K.
    x_p = jnp.pad(x, ((0, b_pad - B), (0, k_pad - feat)))

    const = lambda i: (0, 0)

    out = pl.pallas_call(
        _fused_two_head_kernel,
        out_shape=jax.ShapeDtypeStruct((b_pad, _OUT_LANES), jnp.float32),
        grid=(b_pad // tb,),
        in_specs=[
            pl.BlockSpec((tb, k_pad), lambda i: (i, 0)),   # x: streamed per tile
            pl.BlockSpec((k_pad, h2), const),              # fused weights stay
            pl.BlockSpec((1, h2), const),                  # VMEM-resident across
            pl.BlockSpec((h2, h2), const),                 # the whole grid
            pl.BlockSpec((1, h2), const),
            pl.BlockSpec((h2, _OUT_LANES), const),
            pl.BlockSpec((1, _OUT_LANES), const),
        ],
        # Output block's last dim (8) equals the full array's last dim, so the
        # (8,128) divisibility rule is satisfied; masked stores are fine since
        # the kernel is HBM-bound, not store-slot-bound.
        out_specs=pl.BlockSpec((tb, _OUT_LANES), lambda i: (i, 0)),
        compiler_params=pltpu.CompilerParams(
            dimension_semantics=("parallel",),
            # Double-buffered tiles at tb=8192 use ~3 MiB; 32 MiB fits every
            # generation's scoped budget (incl. v7x's 64 MiB physical VMEM).
            vmem_limit_bytes=32 * 1024 * 1024,
        ),
    )(x_p, w1, b1, w2, b2, w3, b3)

    return out[:B, 0], out[:B, 1]


def init_params(key, input_size=18, hidden_size=32):
    """Deterministic synthetic parameters (PyTorch-Linear-like uniform init).

    Weights are stored (in, out) -- transposed vs. torch -- so y = x @ W + b.
    """
    keys = jax.random.split(key, 12)

    def linear(kw, kb, fan_in, fan_out):
        bound = 1.0 / jnp.sqrt(jnp.float32(fan_in))
        w = jax.random.uniform(kw, (fan_in, fan_out), jnp.float32, -bound, bound)
        b = jax.random.uniform(kb, (1, fan_out), jnp.float32, -bound, bound)
        return w, b

    cw1, cb1 = linear(keys[0], keys[1], input_size, hidden_size)
    cw2, cb2 = linear(keys[2], keys[3], hidden_size, hidden_size)
    cw3, cb3 = linear(keys[4], keys[5], hidden_size, 1)
    qw1, qb1 = linear(keys[6], keys[7], input_size, hidden_size)
    qw2, qb2 = linear(keys[8], keys[9], hidden_size, hidden_size)
    qw3, qb3 = linear(keys[10], keys[11], hidden_size, 1)

    return dict(
        cw1=cw1, cb1=cb1, cw2=cw2, cb2=cb2, cw3=cw3, cb3=cb3,
        qw1=qw1, qb1=qb1, qw2=qw2, qb2=qb2, qw3=qw3, qb3=qb3,
    )


def _reference_forward(x, p):
    """Pure-JAX reference (matches the PyTorch forward)."""
    h = jax.nn.relu(x @ p["cw1"] + p["cb1"])
    h = jax.nn.relu(h @ p["cw2"] + p["cb2"])
    c = jax.nn.sigmoid(h @ p["cw3"] + p["cb3"])
    g = jax.nn.relu(x @ p["qw1"] + p["qb1"])
    g = jax.nn.relu(g @ p["qw2"] + p["qb2"])
    q = jax.nn.sigmoid(g @ p["qw3"] + p["qb3"])
    return jnp.squeeze(c, -1), jnp.squeeze(q, -1)


if __name__ == "__main__":
    key = jax.random.PRNGKey(0)
    k_x, k_x2, k_x3, k_p = jax.random.split(key, 4)

    batch, input_size, hidden_size = 8, 18, 32
    params = init_params(k_p, input_size=input_size, hidden_size=hidden_size)
    packed = pack_params(params, input_size=input_size)   # done once, not per call

    # Small batch (single grid step).
    x = jax.random.normal(k_x, (batch, input_size), dtype=jnp.float32)
    char_score, qual_score = response_quality_forward(x, packed)
    char_score = jax.block_until_ready(char_score)
    qual_score = jax.block_until_ready(qual_score)

    ref_char, ref_qual = _reference_forward(x, params)
    assert char_score.shape == (batch,) and qual_score.shape == (batch,)
    assert jnp.allclose(char_score, ref_char, atol=1e-5, rtol=0)
    assert jnp.allclose(qual_score, ref_qual, atol=1e-5, rtol=0)

    # Ragged batch (exercises row padding / slicing).
    x2 = jax.random.normal(k_x2, (5, input_size), dtype=jnp.float32)
    c2, q2 = response_quality_forward(x2, packed)
    c2 = jax.block_until_ready(c2)
    q2 = jax.block_until_ready(q2)
    r_c2, r_q2 = _reference_forward(x2, params)
    assert c2.shape == (5,) and q2.shape == (5,)
    assert jnp.allclose(c2, r_c2, atol=1e-5, rtol=0)
    assert jnp.allclose(q2, r_q2, atol=1e-5, rtol=0)

    # Multi-tile grid (exercises the pipelined "parallel" batch axis and
    # adaptive tiling with a non-multiple batch) -- small shapes on purpose.
    x3 = jax.random.normal(k_x3, (150, input_size), dtype=jnp.float32)
    c3, q3 = response_quality_forward(x3, packed, tile_rows=64)
    c3 = jax.block_until_ready(c3)
    q3 = jax.block_until_ready(q3)
    r_c3, r_q3 = _reference_forward(x3, params)
    assert c3.shape == (150,) and q3.shape == (150,)
    assert jnp.allclose(c3, r_c3, atol=1e-5, rtol=0)
    assert jnp.allclose(q3, r_q3, atol=1e-5, rtol=0)

    print("KERNEL_OK")
</pallas_src>

<mosaic_0001>
module attributes {stable_mosaic.version = 11 : i64} {
  func.func @_fused_two_head_kernel(%arg0: i32, %arg1: memref<8x24xf32, #tpu.memory_space<vmem>>, %arg2: memref<24x64xf32, #tpu.memory_space<vmem>>, %arg3: memref<1x64xf32, #tpu.memory_space<vmem>>, %arg4: memref<64x64xf32, #tpu.memory_space<vmem>>, %arg5: memref<1x64xf32, #tpu.memory_space<vmem>>, %arg6: memref<64x8xf32, #tpu.memory_space<vmem>>, %arg7: memref<1x8xf32, #tpu.memory_space<vmem>>, %arg8: memref<8x8xf32, #tpu.memory_space<vmem>>) attributes {dimension_semantics = [#tpu.dimension_semantics<parallel>], iteration_bounds = array<i64: 1>, scalar_prefetch = 0 : i64, scratch_operands = 0 : i64, tpu.core_type = #tpu.core_type<tc>, window_params = [{transform_indices = @transform_0, window_bounds = array<i64: 8, 24>}, {pipeline_mode = #tpu.pipeline_mode<synchronous>, transform_indices = @transform_1, window_bounds = array<i64: 24, 64>}, {pipeline_mode = #tpu.pipeline_mode<synchronous>, transform_indices = @transform_2, window_bounds = array<i64: 1, 64>}, {pipeline_mode = #tpu.pipeline_mode<synchronous>, transform_indices = @transform_3, window_bounds = array<i64: 64, 64>}, {pipeline_mode = #tpu.pipeline_mode<synchronous>, transform_indices = @transform_4, window_bounds = array<i64: 1, 64>}, {pipeline_mode = #tpu.pipeline_mode<synchronous>, transform_indices = @transform_5, window_bounds = array<i64: 64, 8>}, {pipeline_mode = #tpu.pipeline_mode<synchronous>, transform_indices = @transform_6, window_bounds = array<i64: 1, 8>}, {transform_indices = @transform_7, window_bounds = array<i64: 8, 8>}]} {
    %c0 = arith.constant 0 : index
    %c0_0 = arith.constant 0 : index
    %0 = vector.load %arg1[%c0, %c0_0] : memref<8x24xf32, #tpu.memory_space<vmem>>, vector<8x24xf32>
    %c0_1 = arith.constant 0 : index
    %c0_2 = arith.constant 0 : index
    %1 = vector.load %arg2[%c0_1, %c0_2] : memref<24x64xf32, #tpu.memory_space<vmem>>, vector<24x64xf32>
    %cst = arith.constant dense<0.000000e+00> : vector<8x64xf32>
    %2 = tpu.matmul %0, %1, %cst {dimension_numbers = #tpu.dot_dimension_numbers<[1], [0], [0], [1], [0, 0, 1, 1], [], []>} : vector<8x24xf32>, vector<24x64xf32>, vector<8x64xf32> -> vector<8x64xf32>
    %c0_3 = arith.constant 0 : index
    %c0_4 = arith.constant 0 : index
    %3 = vector.load %arg3[%c0_3, %c0_4] : memref<1x64xf32, #tpu.memory_space<vmem>>, vector<1x64xf32>
    %4 = vector.broadcast %3 : vector<1x64xf32> to vector<8x64xf32>
    %5 = arith.addf %2, %4 : vector<8x64xf32>
    %cst_5 = arith.constant 0.000000e+00 : f32
    %6 = vector.broadcast %cst_5 : f32 to vector<8x64xf32>
    %7 = arith.maximumf %5, %6 : vector<8x64xf32>
    %c0_6 = arith.constant 0 : index
    %c0_7 = arith.constant 0 : index
    %8 = vector.load %arg4[%c0_6, %c0_7] : memref<64x64xf32, #tpu.memory_space<vmem>>, vector<64x64xf32>
    %cst_8 = arith.constant dense<0.000000e+00> : vector<8x64xf32>
    %9 = tpu.matmul %7, %8, %cst_8 {dimension_numbers = #tpu.dot_dimension_numbers<[1], [0], [0], [1], [0, 0, 1, 1], [], []>} : vector<8x64xf32>, vector<64x64xf32>, vector<8x64xf32> -> vector<8x64xf32>
    %c0_9 = arith.constant 0 : index
    %c0_10 = arith.constant 0 : index
    %10 = vector.load %arg5[%c0_9, %c0_10] : memref<1x64xf32, #tpu.memory_space<vmem>>, vector<1x64xf32>
    %11 = vector.broadcast %10 : vector<1x64xf32> to vector<8x64xf32>
    %12 = arith.addf %9, %11 : vector<8x64xf32>
    %cst_11 = arith.constant 0.000000e+00 : f32
    %13 = vector.broadcast %cst_11 : f32 to vector<8x64xf32>
    %14 = arith.maximumf %12, %13 : vector<8x64xf32>
    %c0_12 = arith.constant 0 : index
    %c0_13 = arith.constant 0 : index
    %15 = vector.load %arg6[%c0_12, %c0_13] : memref<64x8xf32, #tpu.memory_space<vmem>>, vector<64x8xf32>
    %cst_14 = arith.constant dense<0.000000e+00> : vector<8x8xf32>
    %16 = tpu.matmul %14, %15, %cst_14 {dimension_numbers = #tpu.dot_dimension_numbers<[1], [0], [0], [1], [0, 0, 1, 1], [], []>} : vector<8x64xf32>, vector<64x8xf32>, vector<8x8xf32> -> vector<8x8xf32>
    %c0_15 = arith.constant 0 : index
    %c0_16 = arith.constant 0 : index
    %17 = vector.load %arg7[%c0_15, %c0_16] : memref<1x8xf32, #tpu.memory_space<vmem>>, vector<1x8xf32>
    %18 = vector.broadcast %17 : vector<1x8xf32> to vector<8x8xf32>
    %19 = arith.addf %16, %18 : vector<8x8xf32>
    %cst_17 = arith.constant 0.000000e+00 : f32
    %20 = vector.broadcast %cst_17 : f32 to vector<8x8xf32>
    %21 = arith.subf %20, %19 : vector<8x8xf32>
    %22 = math.exp %21 : vector<8x8xf32>
    %cst_18 = arith.constant 1.000000e+00 : f32
    %23 = vector.broadcast %cst_18 : f32 to vector<8x8xf32>
    %24 = arith.addf %23, %22 : vector<8x8xf32>
    %25 = tpu.reciprocal %24 : vector<8x8xf32> -> vector<8x8xf32>
    %c0_19 = arith.constant 0 : index
    %c0_20 = arith.constant 0 : index
    %26 = vector.load %arg8[%c0_19, %c0_20] : memref<8x8xf32, #tpu.memory_space<vmem>>, vector<8x8xf32>
    tpu.vector_store %arg8[%c0_19, %c0_20], %25 {strides = array<i32>} : memref<8x8xf32, #tpu.memory_space<vmem>>, vector<8x8xf32>,
    return
  }
  func.func @transform_0(%arg0: i32) -> (i32, i32) {
    %c0_i32 = arith.constant 0 : i32
    %c0_i32_0 = arith.constant 0 : i32
    return %arg0, %c0_i32 : i32, i32
  }
  func.func @transform_1(%arg0: i32) -> (i32, i32) {
    %c0_i32 = arith.constant 0 : i32
    %c0_i32_0 = arith.constant 0 : i32
    %c0_i32_1 = arith.constant 0 : i32
    return %c0_i32, %c0_i32_0 : i32, i32
  }
  func.func @transform_2(%arg0: i32) -> (i32, i32) {
    %c0_i32 = arith.constant 0 : i32
    %c0_i32_0 = arith.constant 0 : i32
    %c0_i32_1 = arith.constant 0 : i32
    return %c0_i32, %c0_i32_0 : i32, i32
  }
  func.func @transform_3(%arg0: i32) -> (i32, i32) {
    %c0_i32 = arith.constant 0 : i32
    %c0_i32_0 = arith.constant 0 : i32
    %c0_i32_1 = arith.constant 0 : i32
    return %c0_i32, %c0_i32_0 : i32, i32
  }
  func.func @transform_4(%arg0: i32) -> (i32, i32) {
    %c0_i32 = arith.constant 0 : i32
    %c0_i32_0 = arith.constant 0 : i32
    %c0_i32_1 = arith.constant 0 : i32
    return %c0_i32, %c0_i32_0 : i32, i32
  }
  func.func @transform_5(%arg0: i32) -> (i32, i32) {
    %c0_i32 = arith.constant 0 : i32
    %c0_i32_0 = arith.constant 0 : i32
    %c0_i32_1 = arith.constant 0 : i32
    return %c0_i32, %c0_i32_0 : i32, i32
  }
  func.func @transform_6(%arg0: i32) -> (i32, i32) {
    %c0_i32 = arith.constant 0 : i32
    %c0_i32_0 = arith.constant 0 : i32
    %c0_i32_1 = arith.constant 0 : i32
    return %c0_i32, %c0_i32_0 : i32, i32
  }
  func.func @transform_7(%arg0: i32) -> (i32, i32) {
    %c0_i32 = arith.constant 0 : i32
    %c0_i32_0 = arith.constant 0 : i32
    return %arg0, %c0_i32 : i32, i32
  }
}

</mosaic_0001>

<bundles_post_ra>
// kernel: tpu_custom_call.1
= control target key start
LH: loop header
LB: loop body
LE: loop exit
PB: predicated region body
PF: predicated region fallthrough
CT: control target
= control target key end

     0   :  { %12 = vsyncpa [#allocation3], 0  ;;  %s632_s0 = inlined_call_operand.vmem [shape: f32[8,24], index: 0, kind: input, shape index: {}]   ;;  %s633_s1 = inlined_call_operand.hbm [shape: f32[24,64], index: 1, kind: input, shape index: {}]   ;;  %s634_s2 = inlined_call_operand.vmem [shape: f32[1,64], index: 2, kind: input, shape index: {}]   ;;  %s635_s3 = inlined_call_operand.vmem [shape: f32[64,64], index: 3, kind: input, shape index: {}]   ;;  %s636_s4 = inlined_call_operand.hbm [shape: f32[1,64], index: 4, kind: input, shape index: {}]   ;;  %s637_s5 = inlined_call_operand.vmem [shape: f32[64,8], index: 5, kind: input, shape index: {}]   ;;  %s638_s6 = inlined_call_operand.vmem [shape: f32[1,8], index: 6, kind: input, shape index: {}]   ;;  %s639_s7 = inlined_call_operand.hbm [shape: f32[8,8], index: 7, kind: output, shape index: {}]  }
   0x1   :  { %13 = vsyncpa [#allocation6], 0 }
   0x2   :  { %14 = vsyncpa [#allocation4], 0  ;;  %s492_s24 = smov [#allocation2]  }
   0x3   :  { %s22_s25 = sshll.u32 %s492_s24, 4  ;;  %s23_s25 = int_to_ptr.vmem [resolvable:$true] %s22_s25 }
   0x4   :  { %s434_s26 = scalar_lea.vmem %s23_s25, 384  ;;  %p439_p1 = scmp.lt.s32.totalorder %s23_s25, %s23_s25 }
   0x5   :  { %p435_p0 = scmp.ne.s32.totalorder %s23_s25, %s434_s26  ;;  %p440_p2 = scmp.lt.s32.totalorder %s434_s26, %s434_s26 }
   0x7   :  { %p441_p3 = por %p440_p2, %p439_p1 }
   0x9   :  { %p442_p4 = pnand %p441_p3, %p435_p0 }
   0xb   :  { %445 = shalt.err (!%p442_p4)
}
   0xc   :  { %s493_s27 = smov 128   ;;  %s494_s28 = smov 8  }
   0xd   :  { %28 = dma.hbm_to_vmem [thread:$0]  %s633_s1, 384, %s23_s25, [#allocation3], %s493_s27, %s493_s27, %s494_s28  }
   0xe   :  { %s495_s8 = smov [#allocation5]  }
   0xf   :  { %s39_s9 = sshll.u32 %s495_s8, 4  ;;  %s40_s9 = int_to_ptr.vmem [resolvable:$true] %s39_s9 }
  0x10   :  { %s454_s10 = scalar_lea.vmem %s40_s9, 16  ;;  %s458_s11 = scalar_lea.vmem %s40_s9, 32 }
  0x11   :  { %p455_p5 = scmp.ne.s32.totalorder %s40_s9, %s454_s10  ;;  %p459_p6 = scmp.lt.s32.totalorder %s40_s9, %s40_s9 }
  0x12   :  { %p460_p7 = scmp.lt.s32.totalorder %s458_s11, %s454_s10 }
  0x14   :  { %p461_p8 = por %p460_p7, %p459_p6 }
  0x16   :  { %p462_p9 = pnand %p461_p8, %p455_p5 }
  0x18   :  { %465 = shalt.err (!%p462_p9)
}
  0x19   :  { %42 = dma.hbm_to_vmem [thread:$0]  %s636_s4, 16, %s40_s9, [#allocation6]  }
  0x1a   :  { %486 = dma.done.wait [#allocation3], 384  }
  0x1b   :  { %487 = vsyncadd [#allocation3], 4294966912 }
  0x1c   :  { %488 = dma.done.wait [#allocation6], 16  }
  0x1d   :  { %489 = vsyncadd [#allocation6], 4294967280  ;;  %v496_v0 = vmov 0.0   ;;  %vm497_vm0 = vmmov 0   ;;  %v56_v1 = vld [vmem:[#allocation2 + $0x10] sm:$0xff]  ;;  %v55_v2 = vld [vmem:[#allocation2 + $0x8] sm:$0xff] }
  0x1e   :  { %368 = vmatprep.subr.mxu0 %v496_v0  ;;  %374 = vmatprep.mubr.msk.f32.mxu0 %vm497_vm0, %v496_v0  ;;  %v146_v3 = vld [vmem:[%s635_s3 + $0x38] sm:$0xff]  ;;  %v145_v4 = vld [vmem:[%s635_s3 + $0x30] sm:$0xff]  ;;  %v54_v5 = vld [vmem:[#allocation2] sm:$0xff]  ;;  %vm64_vm1 = vcmask 195584   ;;  %vm154_vm2 = vcmask 523264   ;;  %vm322_vm3 = vcmask 64512  }
  0x1f   :  { %377 = vmatprep.subr.mxu1 %v496_v0  ;;  %393 = vmatprep.mubr.msk.f32.mxu1 %vm497_vm0, %v496_v0  ;;  %v53_v6 = vld [vmem:[%s632_s0] sm:$0xff]  ;;  %v144_v7 = vld [vmem:[%s635_s3 + $0x28] sm:$0xff]  ;;  %v142_v9 = vld [vmem:[%s635_s3 + $0x18] sm:$0xff] }
  0x20   :  { %369 = vmatpush3.msra.mxu0 %v56_v1  ;;  %378 = vmatpush3.msra.mxu1 %v146_v3  ;;  %v143_v8 = vld [vmem:[%s635_s3 + $0x20] sm:$0xff]  ;;  %v141_v10 = vld [vmem:[%s635_s3 + $0x10] sm:$0xff]  ;;  %v140_v11 = vld [vmem:[%s635_s3 + $0x8] sm:$0xff] }
  0x21   :  { %370 = vmatprep.subr.mxu0 %v496_v0  ;;  %379 = vmatprep.subr.mxu1 %v496_v0  ;;  %v139_v12 = vld [vmem:[%s635_s3] sm:$0xff]  ;;  %v236_v13 = vld [vmem:[%s637_s5 + $0x38] sm:$0xff]  ;;  %v235_v14 = vld [vmem:[%s637_s5 + $0x30] sm:$0xff] }
  0x22   :  { %371 = vmatpush3.msra.mxu0 %v55_v2  ;;  %380 = vmatpush3.msra.mxu1 %v145_v4  ;;  %v234_v15 = vld [vmem:[%s637_s5 + $0x28] sm:$0xff]  ;;  %v233_v16 = vld [vmem:[%s637_s5 + $0x20] sm:$0xff]  ;;  %v232_v17 = vld [vmem:[%s637_s5 + $0x18] sm:$0xff] }
  0x23   :  { %372 = vmatprep.subr.mxu0 %v496_v0  ;;  %381 = vmatprep.subr.mxu1 %v496_v0  ;;  %v340_v18 = vld [vmem:[%s634_s2] ss:$0 sm:$0xff]  ;;  %v231_v23 = vld [vmem:[%s637_s5 + $0x10] sm:$0xff]  ;;  %v230_v24 = vld [vmem:[%s637_s5 + $0x8] sm:$0xff] }
  0x24   :  { %373 = vmatpush3.msra.mxu0 %v54_v5  ;;  %382 = vmatpush3.msra.mxu1 %v144_v7  ;;  %v229_v25 = vld [vmem:[%s637_s5] sm:$0xff]  ;;  %v342_v26 = vld [vmem:[#allocation5] ss:$0 sm:$0xff]  ;;  %s498_s5 = smov [#allocation7]  }
  0x25   :  { %375 = vmatmul.mubr.msk.f32.vlgmr.msra.gmra.mxu0 %vm64_vm1, %v53_v6  ;;  %383 = vmatprep.subr.mxu1 %v496_v0  ;;  %v344_v31 = vld [vmem:[%s638_s6] ss:$0 sm:$0xff]  ;;  %s330_s0 = sshll.u32 %s498_s5, 4  ;;  %s331_s0 = int_to_ptr.vmem [resolvable:$true] %s330_s0 }
  0x26   :  { %396 = vmatprep.subr.mxu0 %v496_v0  ;;  %384 = vmatpush3.msra.mxu1 %v143_v8  ;;  %s466_s22 = scalar_lea.vmem %s331_s0, 128  ;;  %p471_p11 = scmp.lt.s32.totalorder %s331_s0, %s331_s0 }
  0x27   :  { %412 = vmatprep.mubr.msk.f32.mxu0 %vm497_vm0, %v496_v0  ;;  %385 = vmatprep.subr.mxu1 %v496_v0  ;;  %p467_p10 = scmp.ne.s32.totalorder %s331_s0, %s466_s22  ;;  %p472_p12 = scmp.lt.s32.totalorder %s466_s22, %s466_s22 }
  0x28   :  { %386 = vmatpush3.msra.mxu1 %v142_v9  ;;  %397 = vmatpush3.msra.mxu0 %v236_v13 }
  0x29   :  { %387 = vmatprep.subr.mxu1 %v496_v0  ;;  %398 = vmatprep.subr.mxu0 %v496_v0  ;;  %p473_p13 = por %p472_p12, %p471_p11 }
  0x2a   :  { %388 = vmatpush3.msra.mxu1 %v141_v10  ;;  %399 = vmatpush3.msra.mxu0 %v235_v14 }
  0x2b   :  { %389 = vmatprep.subr.mxu1 %v496_v0  ;;  %400 = vmatprep.subr.mxu0 %v496_v0  ;;  %p474_p0 = pnand %p473_p13, %p467_p10 }
  0x2c   :  { %390 = vmatpush3.msra.mxu1 %v140_v11  ;;  %401 = vmatpush3.msra.mxu0 %v234_v15 }
  0x2d   :  { %391 = vmatprep.subr.mxu1 %v496_v0  ;;  %402 = vmatprep.subr.mxu0 %v496_v0 }
  0x2e   :  { %392 = vmatpush3.msra.mxu1 %v139_v12  ;;  %403 = vmatpush3.msra.mxu0 %v233_v16 }
  0x2f   :  { %404 = vmatprep.subr.mxu0 %v496_v0 }
  0x30   :  { %405 = vmatpush3.msra.mxu0 %v232_v17 }
  0x31   :  { %406 = vmatprep.subr.mxu0 %v496_v0 }
  0x32   :  { %407 = vmatpush3.msra.mxu0 %v231_v23 }
  0x33   :  { %408 = vmatprep.subr.mxu0 %v496_v0 }
  0x34   :  { %409 = vmatpush3.msra.mxu0 %v230_v24 }
  0x35   :  { %410 = vmatprep.subr.mxu0 %v496_v0 }
  0x36   :  { %411 = vmatpush3.msra.mxu0 %v229_v25 }
  0xe5   :  { %v134_v19 = vpop.f32.mrf.mxu0 }
  0xe6   :  { %v135_v20 = vadd.f32 %v340_v18, %v134_v19 }
  0xe7   :  { %v376_v21 = vpop.f32.mrf.mxu0 }
  0xe8   :  { %v138_v22 = vmax.f32 %v135_v20, 0.0 }
  0xea   :  { %394 = vmatmul.mubr.msk.f32.vlgmr.msra.gmra.mxu1 %vm154_vm2, %v138_v22 }
 0x1aa   :  { %v224_v27 = vpop.f32.mrf.mxu1 }
 0x1ab   :  { %v225_v28 = vadd.f32 %v342_v26, %v224_v27 }
 0x1ac   :  { %v395_v29 = vpop.f32.mrf.mxu1 }
 0x1ad   :  { %v228_v30 = vmax.f32 %v225_v28, 0.0 }
 0x1af   :  { %413 = vmatmul.mubr.msk.f32.vlgmr.msra.gmra.mxu0 %vm154_vm2, %v228_v30 }
 0x26f   :  { %v313_v32 = vpop.f32.mrf.mxu0 }
 0x270   :  { %v314_v33 = vadd.f32 %v344_v31, %v313_v32 }
 0x271   :  { %v414_v34 = vpop.f32.mrf.mxu0 }
 0x272   :  { %v317_v35 = vsub.f32 0.0, %v314_v33 }
 0x274   :  { %v318_v36 = vmul.f32 1.442695, %v317_v35 }
 0x276   :  { %422 = vpow2.f32 %v318_v36 }
 0x283   :  { %v423_v37 = vpop.eup %422 }
 0x284   :  { %v320_v38 = vadd.f32 1.0, %v423_v37 }
 0x286   :  { %424 = vrcp.f32 %v320_v38 }
 0x293   :  { %v425_v39 = vpop.eup %424 }
 0x294   :  { %323 = vst.msk [vmem:[#allocation7] sm:$0xff] %vm322_vm3, %v425_v39 }
 0x295   :  { %477 = shalt.err (!%p474_p0)
}
 0x296   :  { %333 = dma.vmem_to_hbm [thread:$0]  %s331_s0, 128, %s639_s7, [#allocation4]  }
 0x297   :  { %490 = dma.done.wait [#allocation4], 128  }
 0x298   :  { %491 = vsyncadd [#allocation4], 4294967168 }
 0x299   :  { %337 = vsyncpa [#allocation3], 1 }
 0x29a   :  { %338 = vsyncpa [#allocation6], 1 }
 0x29b   :  { %339 = vsyncpa [#allocation4], 1 }

</bundles_post_ra>
